<compile_context>
chip_gen: v7x
topology: tpu7x:2x2x1
jax: 0.10.0
libtpu: 0.0.40
codegen_flags: <defaults>
</compile_context>

<pallas_src>
import functools
import math

import jax
import jax.numpy as jnp
from jax import lax
from jax.experimental import pallas as pl
from jax.experimental.pallas import tpu as pltpu


def _round_up(x, m):
    return (x + m - 1) // m * m


def _sigmoid(x):
    # Explicit form; exp/div have guaranteed Mosaic lowerings. Used identically in the
    # kernel and the pure-JAX reference so numerics match tightly.
    return 1.0 / (1.0 + jnp.exp(-x))


# --------------------------------------------------------------- embedding ---
def _gather_kernel(ids_ref, emb_ref, out_ref, buf, sem, *, G):
    base = pl.program_id(0) * G
    # Issue G row DMAs (HBM -> VMEM scratch) so several are in flight at once.
    for g in range(G):
        row = ids_ref[base + g]
        pltpu.make_async_copy(emb_ref.at[pl.ds(row, 1), :],
                              buf.at[pl.ds(g, 1), :],
                              sem.at[g]).start()
    for g in range(G):
        row = ids_ref[base + g]
        pltpu.make_async_copy(emb_ref.at[pl.ds(row, 1), :],
                              buf.at[pl.ds(g, 1), :],
                              sem.at[g]).wait()
    out_ref[...] = buf[...]


def embedding_lookup(ids, emb_w, *, G=8):
    """ids: [T] int32, emb_w: [V, E] (f32)  ->  [T, E] gathered rows."""
    T = ids.shape[0]
    V, E = emb_w.shape
    Tp = _round_up(T, G)
    ids_p = ids if Tp == T else jnp.pad(ids, (0, Tp - T))
    out = pl.pallas_call(
        functools.partial(_gather_kernel, G=G),
        out_shape=jax.ShapeDtypeStruct((Tp, E), emb_w.dtype),
        grid_spec=pltpu.PrefetchScalarGridSpec(
            num_scalar_prefetch=1,
            grid=(Tp // G,),
            in_specs=[pl.BlockSpec(memory_space=pl.ANY)],   # emb table stays in HBM
            out_specs=pl.BlockSpec((G, E), lambda i, ids_ref: (i, 0)),
            scratch_shapes=[pltpu.VMEM((G, E), emb_w.dtype),
                            pltpu.SemaphoreType.DMA((G,))],
        ),
        compiler_params=pltpu.CompilerParams(dimension_semantics=("parallel",)),
    )(ids_p, emb_w)
    return out[:T] if Tp != T else out


# ------------------------------------------------------------ matmul + bias ---
def _matmul_bias_kernel(x_ref, w_ref, b_ref, o_ref, *, transpose_rhs):
    if transpose_rhs:
        acc = lax.dot_general(x_ref[...], w_ref[...],
                              dimension_numbers=(((1,), (1,)), ((), ())),
                              preferred_element_type=jnp.float32)
    else:
        acc = jnp.dot(x_ref[...], w_ref[...], preferred_element_type=jnp.float32)
    o_ref[...] = (acc + b_ref[...]).astype(o_ref.dtype)


def matmul_bias(x, w, b, *, transpose_rhs=False):
    """x: [M, K], w: [K, N] (or [N, K] when transpose_rhs), b: [N]  ->  [M, N] f32.

    Operands are cast to bf16 (MXU-native on v5e/v6e/v7x), accumulation stays f32.
    M/K/N are padded to tile multiples so arbitrary (unaligned) shapes work.
    """
    M, K = x.shape
    if transpose_rhs:
        N, K2 = w.shape
    else:
        K2, N = w.shape
    assert K2 == K and b.shape == (N,)

    Kp = _round_up(K, 128)
    tm = min(256, _round_up(M, 8))
    Mp = _round_up(M, tm)
    tn = min(512, _round_up(N, 128))
    Np = _round_up(N, tn)

    xb = x.astype(jnp.bfloat16)
    wb = w.astype(jnp.bfloat16)
    if (Mp, Kp) != (M, K):
        xb = jnp.pad(xb, ((0, Mp - M), (0, Kp - K)))
    if transpose_rhs:
        if (Np, Kp) != (N, K):
            wb = jnp.pad(wb, ((0, Np - N), (0, Kp - K)))
        w_spec = pl.BlockSpec((tn, Kp), lambda i, j: (j, 0))
    else:
        if (Kp, Np) != (K, N):
            wb = jnp.pad(wb, ((0, Kp - K), (0, Np - N)))
        w_spec = pl.BlockSpec((Kp, tn), lambda i, j: (0, j))
    bp = b.astype(jnp.float32)
    if Np != N:
        bp = jnp.pad(bp, (0, Np - N))
    b2 = bp.reshape(1, Np)

    n_tiles_n = Np // tn
    cost = pl.CostEstimate(
        flops=2 * Mp * Kp * Np,
        transcendentals=0,
        bytes_accessed=2 * Mp * Kp * n_tiles_n + 2 * Kp * Np + 4 * Np + 4 * Mp * Np,
    )
    out = pl.pallas_call(
        functools.partial(_matmul_bias_kernel, transpose_rhs=transpose_rhs),
        out_shape=jax.ShapeDtypeStruct((Mp, Np), jnp.float32),
        grid_spec=pltpu.PrefetchScalarGridSpec(
            num_scalar_prefetch=0,
            grid=(Mp // tm, Np // tn),
            in_specs=[pl.BlockSpec((tm, Kp), lambda i, j: (i, 0)),
                      w_spec,
                      pl.BlockSpec((1, tn), lambda i, j: (0, j))],
            out_specs=pl.BlockSpec((tm, tn), lambda i, j: (i, j)),
        ),
        compiler_params=pltpu.CompilerParams(
            dimension_semantics=("parallel", "parallel")),
        cost_estimate=cost,
    )(xb, wb, b2)
    if (Mp, Np) != (M, N):
        out = out[:M, :N]
    return out


# -------------------------------------------------------------- recurrence ---
def _lstm_step_kernel(xproj_ref, whhT_ref, h_out_ref, h_scr, c_scr, *, hidden, U):
    @pl.when(pl.program_id(1) == 0)
    def _():
        # TODO(synk): hidden state is zero-initialized every call (matches reset());
        # carrying detached state across calls is host-side bookkeeping, not kernel work.
        h_scr[...] = jnp.zeros_like(h_scr)
        c_scr[...] = jnp.zeros_like(c_scr)

    w = whhT_ref[...]   # bf16, VMEM-resident across the whole time sweep

    def step(u, carry):
        gates = xproj_ref[u] + jnp.dot(h_scr[...].astype(jnp.bfloat16), w,
                                       preferred_element_type=jnp.float32)
        i = _sigmoid(gates[:, 0 * hidden:1 * hidden])
        f = _sigmoid(gates[:, 1 * hidden:2 * hidden])
        g = jnp.tanh(gates[:, 2 * hidden:3 * hidden])
        o = _sigmoid(gates[:, 3 * hidden:4 * hidden])
        c = f * c_scr[...] + i * g
        h = o * jnp.tanh(c)
        c_scr[...] = c
        h_scr[...] = h
        h_out_ref[u] = h.astype(h_out_ref.dtype)
        return carry

    lax.fori_loop(0, U, step, 0, unroll=True)


def _pick_timestep_block(sl, bs_t, H, budget_bytes=24 * 1024 * 1024):
    # Keep resident W_hh^T + double-buffered xproj/out blocks + scratch under the v7x
    # default scoped-VMEM budget (32 MiB) with headroom.
    whh = 2 * (H * 4 * H * 2)                 # bf16, double-buffered by the pipeline
    scr = 2 * (bs_t * H * 4)
    for U in (8, 4, 2, 1):
        if sl % U:
            continue
        xin = 2 * (U * bs_t * 4 * H * 4)      # f32 input blocks
        hout = 2 * (U * bs_t * H * 4)
        if whh + scr + xin + hout <= budget_bytes:
            return U
    return 1


def lstm_recurrence(xproj, whhT):
    """xproj: [sl, bs, 4H] f32 (= x @ W_ih^T + b), whhT: [H, 4H]  ->  h seq [sl, bs, H]."""
    sl, bs, four_h = xproj.shape
    H = whhT.shape[0]
    assert four_h == 4 * H and whhT.shape == (H, four_h)
    # TODO(synk): unaligned hidden sizes (e.g. H=1150) need per-gate padding of
    # W_ih/W_hh/b at parameter-prep time; sizes used here are already 128-aligned.
    assert H % 128 == 0 and four_h % 128 == 0

    nb = 2 if (bs % 2 == 0 and (bs // 2) % 8 == 0) else 1   # batch-split for v7x megacore
    bs_t = bs // nb
    U = _pick_timestep_block(sl, bs_t, H)
    whhT_b = whhT.astype(jnp.bfloat16)

    cost = pl.CostEstimate(
        flops=2 * sl * bs * H * four_h + 12 * sl * bs * four_h,
        transcendentals=5 * sl * bs * H,
        bytes_accessed=sl * bs * four_h * 4 + H * four_h * 2 * nb + sl * bs * H * 4,
    )
    return pl.pallas_call(
        functools.partial(_lstm_step_kernel, hidden=H, U=U),
        out_shape=jax.ShapeDtypeStruct((sl, bs, H), jnp.float32),
        grid_spec=pltpu.PrefetchScalarGridSpec(
            num_scalar_prefetch=0,
            grid=(nb, sl // U),
            in_specs=[
                pl.BlockSpec((U, bs_t, four_h), lambda b, t: (t, b, 0)),
                pl.BlockSpec((H, four_h), lambda b, t: (0, 0)),  # W_hh^T resident
            ],
            out_specs=pl.BlockSpec((U, bs_t, H), lambda b, t: (t, b, 0)),
            scratch_shapes=[pltpu.VMEM((bs_t, H), jnp.float32),
                            pltpu.VMEM((bs_t, H), jnp.float32)],
        ),
        compiler_params=pltpu.CompilerParams(
            dimension_semantics=("parallel", "arbitrary")),
        cost_estimate=cost,
    )(xproj, whhT_b)


# ------------------------------------------------------------ full forward ---
def lstm_language_model_forward(token_ids, params):
    """Inference forward of LSTMLanguageModel.

    token_ids: [bs, sl] int32.  Returns (decoded [bs, sl, V], raw_outputs, drop_outputs).
    """
    bs, sl = token_ids.shape
    emb_w = params["emb_w"]              # [V, E] f32 (tied decoder weight)
    emb_w_bf16 = params["emb_w_bf16"]    # pre-cast once at param prep
    dec_b = params["dec_b"]              # [V]
    V, E = emb_w.shape

    # Time-major once (cheap int32 transpose); the whole data path below stays
    # [sl*bs, ...], so no per-layer activation transposes are needed.
    ids_tm = token_ids.T.reshape(-1).astype(jnp.int32)
    outputs = embedding_lookup(ids_tm, emb_w)                  # [sl*bs, E]
    # encoder_dp / input_dp / hidden_dps / output_dp / WeightDropout: identity at inference.

    raw_outputs = []
    for layer in params["layers"]:
        H = layer["w_hhT_bf16"].shape[0]
        xproj = matmul_bias(outputs, layer["w_ihT_bf16"], layer["b"])      # [sl*bs, 4H]
        h_seq = lstm_recurrence(xproj.reshape(sl, bs, 4 * H), layer["w_hhT_bf16"])
        outputs = h_seq.reshape(sl * bs, H)                    # stays time-major
        raw_outputs.append(h_seq.transpose(1, 0, 2))           # returned batch-major

    # Only the small final hidden is transposed back to batch-major; the tied decoder
    # weight (V, E) is consumed directly (contraction on its E axis, no emb_w.T copy).
    out_bm = outputs.reshape(sl, bs, -1).transpose(1, 0, 2).reshape(bs * sl, -1)
    decoded = matmul_bias(out_bm, emb_w_bf16, dec_b, transpose_rhs=True)   # [bs*sl, V]
    decoded = decoded.reshape(bs, sl, V)
    drop_outputs = list(raw_outputs)                           # dropout == identity here
    return decoded, raw_outputs, drop_outputs


# -------------------------------------------------------------- parameters ---
def init_params(key, vocab_size, emb_size, hidden_size, num_layers):
    keys = jax.random.split(key, 2 + 4 * num_layers)
    emb_w = jax.random.uniform(keys[0], (vocab_size, emb_size), jnp.float32, -0.1, 0.1)
    dec_b = jnp.zeros((vocab_size,), jnp.float32)
    layers = []
    in_size = emb_size
    for l in range(num_layers):
        out_size = hidden_size if l != num_layers - 1 else emb_size
        k = 1.0 / math.sqrt(out_size)
        kk = keys[2 + 4 * l: 6 + 4 * l]
        w_ih = jax.random.uniform(kk[0], (4 * out_size, in_size), jnp.float32, -k, k)
        w_hh = jax.random.uniform(kk[1], (4 * out_size, out_size), jnp.float32, -k, k)
        b_ih = jax.random.uniform(kk[2], (4 * out_size,), jnp.float32, -k, k)
        b_hh = jax.random.uniform(kk[3], (4 * out_size,), jnp.float32, -k, k)
        # Host-side folds (done once): pre-transpose, merge biases, pre-cast to bf16.
        layers.append(dict(
            w_ihT=w_ih.T, w_hhT=w_hh.T, b=b_ih + b_hh,
            w_ihT_bf16=w_ih.T.astype(jnp.bfloat16),
            w_hhT_bf16=w_hh.T.astype(jnp.bfloat16)))
        in_size = out_size
    return dict(emb_w=emb_w, emb_w_bf16=emb_w.astype(jnp.bfloat16),
                dec_b=dec_b, layers=layers)


# ---------------------------------------------------------- pure-JAX reference
def _ref_forward(token_ids, params):
    """Reference with the same numerics choice (bf16 matmul operands, f32 accumulation)."""
    bs, sl = token_ids.shape
    emb_w = params["emb_w"]
    outputs = emb_w[token_ids.reshape(-1)].reshape(bs, sl, -1)
    for layer in params["layers"]:
        w_ihT, w_hhT, b = layer["w_ihT_bf16"], layer["w_hhT_bf16"], layer["b"]
        H = w_hhT.shape[0]
        xproj = (jnp.dot(outputs.reshape(bs * sl, -1).astype(jnp.bfloat16), w_ihT,
                         preferred_element_type=jnp.float32)
                 + b).reshape(bs, sl, 4 * H)
        h = jnp.zeros((bs, H), jnp.float32)
        c = jnp.zeros((bs, H), jnp.float32)
        hs = []
        for t in range(sl):
            gates = xproj[:, t, :] + jnp.dot(h.astype(jnp.bfloat16), w_hhT,
                                             preferred_element_type=jnp.float32)
            i = _sigmoid(gates[:, :H])
            f = _sigmoid(gates[:, H:2 * H])
            g = jnp.tanh(gates[:, 2 * H:3 * H])
            o = _sigmoid(gates[:, 3 * H:])
            c = f * c + i * g
            h = o * jnp.tanh(c)
            hs.append(h)
        outputs = jnp.stack(hs, axis=1)
    decoded = (lax.dot_general(outputs.reshape(bs * sl, -1).astype(jnp.bfloat16),
                               params["emb_w_bf16"],
                               (((1,), (1,)), ((), ())),
                               preferred_element_type=jnp.float32)
               + params["dec_b"])
    return decoded.reshape(bs, sl, -1)


if __name__ == "__main__":
    # Small deterministic shapes consistent with the module's forward
    # (vocab, emb, hidden scaled down; 2 LSTM layers; batch=2, seq=8).
    vocab_size, emb_size, hidden_size, num_layers = 128, 128, 256, 2
    bs, sl = 2, 8

    key = jax.random.PRNGKey(0)
    kp, kt = jax.random.split(key)
    params = init_params(kp, vocab_size, emb_size, hidden_size, num_layers)
    token_ids = jax.random.randint(kt, (bs, sl), 0, vocab_size, dtype=jnp.int32)

    decoded, raw_outputs, drop_outputs = lstm_language_model_forward(token_ids, params)
    decoded = jax.block_until_ready(decoded)

    ref = _ref_forward(token_ids, params)
    assert decoded.shape == (bs, sl, vocab_size)
    max_diff = float(jnp.max(jnp.abs(decoded - ref)))
    assert jnp.allclose(decoded, ref, rtol=1e-2, atol=1e-3), (
        "mismatch vs reference, max abs diff = %e" % max_diff)

    print("KERNEL_OK")
</pallas_src>

<mosaic_0001>
module attributes {stable_mosaic.version = 11 : i64} {
  func.func @_gather_kernel(%arg0: i32, %arg1: memref<16xi32, #tpu.memory_space<smem>>, %arg2: memref<128x128xf32, #tpu.memory_space<any>>, %arg3: memref<8x128xf32, #tpu.memory_space<vmem>>, %arg4: memref<8x128xf32, #tpu.memory_space<vmem>>, %arg5: memref<8x!tpu.dma_semaphore, #tpu.memory_space<semaphore_mem>>) attributes {dimension_semantics = [#tpu.dimension_semantics<parallel>], iteration_bounds = array<i64: 2>, scalar_prefetch = 1 : i64, scratch_operands = 2 : i64, tpu.core_type = #tpu.core_type<tc>, window_params = [{}, {transform_indices = @transform_1, window_bounds = array<i64: 8, 128>}]} {
    %c8_i32 = arith.constant 8 : i32
    %0 = arith.muli %arg0, %c8_i32 : i32
    %c0_i32 = arith.constant 0 : i32
    %1 = arith.addi %0, %c0_i32 : i32
    %2 = arith.index_cast %1 : i32 to index
    %3 = memref.load %arg1[%2] : memref<16xi32, #tpu.memory_space<smem>>
    %c0_i32_0 = arith.constant 0 : i32
    %c0_i32_1 = arith.constant 0 : i32
    %4 = tpu.memref_slice %arg2[%3, %c0_i32_1] : memref<128x128xf32, #tpu.memory_space<any>> -> memref<1x128xf32, #tpu.memory_space<any>>
    %c0_i32_2 = arith.constant 0 : i32
    %c0_i32_3 = arith.constant 0 : i32
    %5 = tpu.memref_slice %arg4[%c0_i32_2, %c0_i32_3] : memref<8x128xf32, #tpu.memory_space<vmem>> -> memref<1x128xf32, #tpu.memory_space<vmem>>
    %6 = tpu.memref_slice %arg5[%c0_i32_0] : memref<8x!tpu.dma_semaphore, #tpu.memory_space<semaphore_mem>> -> memref<1x!tpu.dma_semaphore, #tpu.memory_space<semaphore_mem>>
    %7 = tpu.memref_squeeze %6 : memref<1x!tpu.dma_semaphore, #tpu.memory_space<semaphore_mem>> -> memref<!tpu.dma_semaphore, #tpu.memory_space<semaphore_mem>>
    tpu.enqueue_dma source(%4 : memref<1x128xf32, #tpu.memory_space<any>>) target(%5 : memref<1x128xf32, #tpu.memory_space<vmem>>) target_semaphore(%7 : memref<!tpu.dma_semaphore, #tpu.memory_space<semaphore_mem>>)
    %c1_i32 = arith.constant 1 : i32
    %8 = arith.addi %0, %c1_i32 : i32
    %9 = arith.index_cast %8 : i32 to index
    %10 = memref.load %arg1[%9] : memref<16xi32, #tpu.memory_space<smem>>
    %c1_i32_4 = arith.constant 1 : i32
    %c0_i32_5 = arith.constant 0 : i32
    %11 = tpu.memref_slice %arg2[%10, %c0_i32_5] : memref<128x128xf32, #tpu.memory_space<any>> -> memref<1x128xf32, #tpu.memory_space<any>>
    %c1_i32_6 = arith.constant 1 : i32
    %c0_i32_7 = arith.constant 0 : i32
    %12 = tpu.memref_slice %arg4[%c1_i32_6, %c0_i32_7] : memref<8x128xf32, #tpu.memory_space<vmem>> -> memref<1x128xf32, #tpu.memory_space<vmem>>
    %13 = tpu.memref_slice %arg5[%c1_i32_4] : memref<8x!tpu.dma_semaphore, #tpu.memory_space<semaphore_mem>> -> memref<1x!tpu.dma_semaphore, #tpu.memory_space<semaphore_mem>>
    %14 = tpu.memref_squeeze %13 : memref<1x!tpu.dma_semaphore, #tpu.memory_space<semaphore_mem>> -> memref<!tpu.dma_semaphore, #tpu.memory_space<semaphore_mem>>
    tpu.enqueue_dma source(%11 : memref<1x128xf32, #tpu.memory_space<any>>) target(%12 : memref<1x128xf32, #tpu.memory_space<vmem>>) target_semaphore(%14 : memref<!tpu.dma_semaphore, #tpu.memory_space<semaphore_mem>>)
    %c2_i32 = arith.constant 2 : i32
    %15 = arith.addi %0, %c2_i32 : i32
    %16 = arith.index_cast %15 : i32 to index
    %17 = memref.load %arg1[%16] : memref<16xi32, #tpu.memory_space<smem>>
    %c2_i32_8 = arith.constant 2 : i32
    %c0_i32_9 = arith.constant 0 : i32
    %18 = tpu.memref_slice %arg2[%17, %c0_i32_9] : memref<128x128xf32, #tpu.memory_space<any>> -> memref<1x128xf32, #tpu.memory_space<any>>
    %c2_i32_10 = arith.constant 2 : i32
    %c0_i32_11 = arith.constant 0 : i32
    %19 = tpu.memref_slice %arg4[%c2_i32_10, %c0_i32_11] : memref<8x128xf32, #tpu.memory_space<vmem>> -> memref<1x128xf32, #tpu.memory_space<vmem>>
    %20 = tpu.memref_slice %arg5[%c2_i32_8] : memref<8x!tpu.dma_semaphore, #tpu.memory_space<semaphore_mem>> -> memref<1x!tpu.dma_semaphore, #tpu.memory_space<semaphore_mem>>
    %21 = tpu.memref_squeeze %20 : memref<1x!tpu.dma_semaphore, #tpu.memory_space<semaphore_mem>> -> memref<!tpu.dma_semaphore, #tpu.memory_space<semaphore_mem>>
    tpu.enqueue_dma source(%18 : memref<1x128xf32, #tpu.memory_space<any>>) target(%19 : memref<1x128xf32, #tpu.memory_space<vmem>>) target_semaphore(%21 : memref<!tpu.dma_semaphore, #tpu.memory_space<semaphore_mem>>)
    %c3_i32 = arith.constant 3 : i32
    %22 = arith.addi %0, %c3_i32 : i32
    %23 = arith.index_cast %22 : i32 to index
    %24 = memref.load %arg1[%23] : memref<16xi32, #tpu.memory_space<smem>>
    %c3_i32_12 = arith.constant 3 : i32
    %c0_i32_13 = arith.constant 0 : i32
    %25 = tpu.memref_slice %arg2[%24, %c0_i32_13] : memref<128x128xf32, #tpu.memory_space<any>> -> memref<1x128xf32, #tpu.memory_space<any>>
    %c3_i32_14 = arith.constant 3 : i32
    %c0_i32_15 = arith.constant 0 : i32
    %26 = tpu.memref_slice %arg4[%c3_i32_14, %c0_i32_15] : memref<8x128xf32, #tpu.memory_space<vmem>> -> memref<1x128xf32, #tpu.memory_space<vmem>>
    %27 = tpu.memref_slice %arg5[%c3_i32_12] : memref<8x!tpu.dma_semaphore, #tpu.memory_space<semaphore_mem>> -> memref<1x!tpu.dma_semaphore, #tpu.memory_space<semaphore_mem>>
    %28 = tpu.memref_squeeze %27 : memref<1x!tpu.dma_semaphore, #tpu.memory_space<semaphore_mem>> -> memref<!tpu.dma_semaphore, #tpu.memory_space<semaphore_mem>>
    tpu.enqueue_dma source(%25 : memref<1x128xf32, #tpu.memory_space<any>>) target(%26 : memref<1x128xf32, #tpu.memory_space<vmem>>) target_semaphore(%28 : memref<!tpu.dma_semaphore, #tpu.memory_space<semaphore_mem>>)
    %c4_i32 = arith.constant 4 : i32
    %29 = arith.addi %0, %c4_i32 : i32
    %30 = arith.index_cast %29 : i32 to index
    %31 = memref.load %arg1[%30] : memref<16xi32, #tpu.memory_space<smem>>
    %c4_i32_16 = arith.constant 4 : i32
    %c0_i32_17 = arith.constant 0 : i32
    %32 = tpu.memref_slice %arg2[%31, %c0_i32_17] : memref<128x128xf32, #tpu.memory_space<any>> -> memref<1x128xf32, #tpu.memory_space<any>>
    %c4_i32_18 = arith.constant 4 : i32
    %c0_i32_19 = arith.constant 0 : i32
    %33 = tpu.memref_slice %arg4[%c4_i32_18, %c0_i32_19] : memref<8x128xf32, #tpu.memory_space<vmem>> -> memref<1x128xf32, #tpu.memory_space<vmem>>
    %34 = tpu.memref_slice %arg5[%c4_i32_16] : memref<8x!tpu.dma_semaphore, #tpu.memory_space<semaphore_mem>> -> memref<1x!tpu.dma_semaphore, #tpu.memory_space<semaphore_mem>>
    %35 = tpu.memref_squeeze %34 : memref<1x!tpu.dma_semaphore, #tpu.memory_space<semaphore_mem>> -> memref<!tpu.dma_semaphore, #tpu.memory_space<semaphore_mem>>
    tpu.enqueue_dma source(%32 : memref<1x128xf32, #tpu.memory_space<any>>) target(%33 : memref<1x128xf32, #tpu.memory_space<vmem>>) target_semaphore(%35 : memref<!tpu.dma_semaphore, #tpu.memory_space<semaphore_mem>>)
    %c5_i32 = arith.constant 5 : i32
    %36 = arith.addi %0, %c5_i32 : i32
    %37 = arith.index_cast %36 : i32 to index
    %38 = memref.load %arg1[%37] : memref<16xi32, #tpu.memory_space<smem>>
    %c5_i32_20 = arith.constant 5 : i32
    %c0_i32_21 = arith.constant 0 : i32
    %39 = tpu.memref_slice %arg2[%38, %c0_i32_21] : memref<128x128xf32, #tpu.memory_space<any>> -> memref<1x128xf32, #tpu.memory_space<any>>
    %c5_i32_22 = arith.constant 5 : i32
    %c0_i32_23 = arith.constant 0 : i32
    %40 = tpu.memref_slice %arg4[%c5_i32_22, %c0_i32_23] : memref<8x128xf32, #tpu.memory_space<vmem>> -> memref<1x128xf32, #tpu.memory_space<vmem>>
    %41 = tpu.memref_slice %arg5[%c5_i32_20] : memref<8x!tpu.dma_semaphore, #tpu.memory_space<semaphore_mem>> -> memref<1x!tpu.dma_semaphore, #tpu.memory_space<semaphore_mem>>
    %42 = tpu.memref_squeeze %41 : memref<1x!tpu.dma_semaphore, #tpu.memory_space<semaphore_mem>> -> memref<!tpu.dma_semaphore, #tpu.memory_space<semaphore_mem>>
    tpu.enqueue_dma source(%39 : memref<1x128xf32, #tpu.memory_space<any>>) target(%40 : memref<1x128xf32, #tpu.memory_space<vmem>>) target_semaphore(%42 : memref<!tpu.dma_semaphore, #tpu.memory_space<semaphore_mem>>)
    %c6_i32 = arith.constant 6 : i32
    %43 = arith.addi %0, %c6_i32 : i32
    %44 = arith.index_cast %43 : i32 to index
    %45 = memref.load %arg1[%44] : memref<16xi32, #tpu.memory_space<smem>>
    %c6_i32_24 = arith.constant 6 : i32
    %c0_i32_25 = arith.constant 0 : i32
    %46 = tpu.memref_slice %arg2[%45, %c0_i32_25] : memref<128x128xf32, #tpu.memory_space<any>> -> memref<1x128xf32, #tpu.memory_space<any>>
    %c6_i32_26 = arith.constant 6 : i32
    %c0_i32_27 = arith.constant 0 : i32
    %47 = tpu.memref_slice %arg4[%c6_i32_26, %c0_i32_27] : memref<8x128xf32, #tpu.memory_space<vmem>> -> memref<1x128xf32, #tpu.memory_space<vmem>>
    %48 = tpu.memref_slice %arg5[%c6_i32_24] : memref<8x!tpu.dma_semaphore, #tpu.memory_space<semaphore_mem>> -> memref<1x!tpu.dma_semaphore, #tpu.memory_space<semaphore_mem>>
    %49 = tpu.memref_squeeze %48 : memref<1x!tpu.dma_semaphore, #tpu.memory_space<semaphore_mem>> -> memref<!tpu.dma_semaphore, #tpu.memory_space<semaphore_mem>>
    tpu.enqueue_dma source(%46 : memref<1x128xf32, #tpu.memory_space<any>>) target(%47 : memref<1x128xf32, #tpu.memory_space<vmem>>) target_semaphore(%49 : memref<!tpu.dma_semaphore, #tpu.memory_space<semaphore_mem>>)
    %c7_i32 = arith.constant 7 : i32
    %50 = arith.addi %0, %c7_i32 : i32
    %51 = arith.index_cast %50 : i32 to index
    %52 = memref.load %arg1[%51] : memref<16xi32, #tpu.memory_space<smem>>
    %c7_i32_28 = arith.constant 7 : i32
    %c0_i32_29 = arith.constant 0 : i32
    %53 = tpu.memref_slice %arg2[%52, %c0_i32_29] : memref<128x128xf32, #tpu.memory_space<any>> -> memref<1x128xf32, #tpu.memory_space<any>>
    %c7_i32_30 = arith.constant 7 : i32
    %c0_i32_31 = arith.constant 0 : i32
    %54 = tpu.memref_slice %arg4[%c7_i32_30, %c0_i32_31] : memref<8x128xf32, #tpu.memory_space<vmem>> -> memref<1x128xf32, #tpu.memory_space<vmem>>
    %55 = tpu.memref_slice %arg5[%c7_i32_28] : memref<8x!tpu.dma_semaphore, #tpu.memory_space<semaphore_mem>> -> memref<1x!tpu.dma_semaphore, #tpu.memory_space<semaphore_mem>>
    %56 = tpu.memref_squeeze %55 : memref<1x!tpu.dma_semaphore, #tpu.memory_space<semaphore_mem>> -> memref<!tpu.dma_semaphore, #tpu.memory_space<semaphore_mem>>
    tpu.enqueue_dma source(%53 : memref<1x128xf32, #tpu.memory_space<any>>) target(%54 : memref<1x128xf32, #tpu.memory_space<vmem>>) target_semaphore(%56 : memref<!tpu.dma_semaphore, #tpu.memory_space<semaphore_mem>>)
    %c0_i32_32 = arith.constant 0 : i32
    %57 = arith.addi %0, %c0_i32_32 : i32
    %58 = arith.index_cast %57 : i32 to index
    %59 = memref.load %arg1[%58] : memref<16xi32, #tpu.memory_space<smem>>
    %c0_i32_33 = arith.constant 0 : i32
    %c0_i32_34 = arith.constant 0 : i32
    %60 = tpu.memref_slice %arg2[%59, %c0_i32_34] : memref<128x128xf32, #tpu.memory_space<any>> -> memref<1x128xf32, #tpu.memory_space<any>>
    %c0_i32_35 = arith.constant 0 : i32
    %c0_i32_36 = arith.constant 0 : i32
    %61 = tpu.memref_slice %arg4[%c0_i32_35, %c0_i32_36] : memref<8x128xf32, #tpu.memory_space<vmem>> -> memref<1x128xf32, #tpu.memory_space<vmem>>
    %62 = tpu.memref_slice %arg5[%c0_i32_33] : memref<8x!tpu.dma_semaphore, #tpu.memory_space<semaphore_mem>> -> memref<1x!tpu.dma_semaphore, #tpu.memory_space<semaphore_mem>>
    %63 = tpu.memref_squeeze %62 : memref<1x!tpu.dma_semaphore, #tpu.memory_space<semaphore_mem>> -> memref<!tpu.dma_semaphore, #tpu.memory_space<semaphore_mem>>
    tpu.wait_dma2 semaphore(%63 : memref<!tpu.dma_semaphore, #tpu.memory_space<semaphore_mem>>) src(%60 : memref<1x128xf32, #tpu.memory_space<any>>) dst(%61 : memref<1x128xf32, #tpu.memory_space<vmem>>)
    %c1_i32_37 = arith.constant 1 : i32
    %64 = arith.addi %0, %c1_i32_37 : i32
    %65 = arith.index_cast %64 : i32 to index
    %66 = memref.load %arg1[%65] : memref<16xi32, #tpu.memory_space<smem>>
    %c1_i32_38 = arith.constant 1 : i32
    %c0_i32_39 = arith.constant 0 : i32
    %67 = tpu.memref_slice %arg2[%66, %c0_i32_39] : memref<128x128xf32, #tpu.memory_space<any>> -> memref<1x128xf32, #tpu.memory_space<any>>
    %c1_i32_40 = arith.constant 1 : i32
    %c0_i32_41 = arith.constant 0 : i32
    %68 = tpu.memref_slice %arg4[%c1_i32_40, %c0_i32_41] : memref<8x128xf32, #tpu.memory_space<vmem>> -> memref<1x128xf32, #tpu.memory_space<vmem>>
    %69 = tpu.memref_slice %arg5[%c1_i32_38] : memref<8x!tpu.dma_semaphore, #tpu.memory_space<semaphore_mem>> -> memref<1x!tpu.dma_semaphore, #tpu.memory_space<semaphore_mem>>
    %70 = tpu.memref_squeeze %69 : memref<1x!tpu.dma_semaphore, #tpu.memory_space<semaphore_mem>> -> memref<!tpu.dma_semaphore, #tpu.memory_space<semaphore_mem>>
    tpu.wait_dma2 semaphore(%70 : memref<!tpu.dma_semaphore, #tpu.memory_space<semaphore_mem>>) src(%67 : memref<1x128xf32, #tpu.memory_space<any>>) dst(%68 : memref<1x128xf32, #tpu.memory_space<vmem>>)
    %c2_i32_42 = arith.constant 2 : i32
    %71 = arith.addi %0, %c2_i32_42 : i32
    %72 = arith.index_cast %71 : i32 to index
    %73 = memref.load %arg1[%72] : memref<16xi32, #tpu.memory_space<smem>>
    %c2_i32_43 = arith.constant 2 : i32
    %c0_i32_44 = arith.constant 0 : i32
    %74 = tpu.memref_slice %arg2[%73, %c0_i32_44] : memref<128x128xf32, #tpu.memory_space<any>> -> memref<1x128xf32, #tpu.memory_space<any>>
    %c2_i32_45 = arith.constant 2 : i32
    %c0_i32_46 = arith.constant 0 : i32
    %75 = tpu.memref_slice %arg4[%c2_i32_45, %c0_i32_46] : memref<8x128xf32, #tpu.memory_space<vmem>> -> memref<1x128xf32, #tpu.memory_space<vmem>>
    %76 = tpu.memref_slice %arg5[%c2_i32_43] : memref<8x!tpu.dma_semaphore, #tpu.memory_space<semaphore_mem>> -> memref<1x!tpu.dma_semaphore, #tpu.memory_space<semaphore_mem>>
    %77 = tpu.memref_squeeze %76 : memref<1x!tpu.dma_semaphore, #tpu.memory_space<semaphore_mem>> -> memref<!tpu.dma_semaphore, #tpu.memory_space<semaphore_mem>>
    tpu.wait_dma2 semaphore(%77 : memref<!tpu.dma_semaphore, #tpu.memory_space<semaphore_mem>>) src(%74 : memref<1x128xf32, #tpu.memory_space<any>>) dst(%75 : memref<1x128xf32, #tpu.memory_space<vmem>>)
    %c3_i32_47 = arith.constant 3 : i32
    %78 = arith.addi %0, %c3_i32_47 : i32
    %79 = arith.index_cast %78 : i32 to index
    %80 = memref.load %arg1[%79] : memref<16xi32, #tpu.memory_space<smem>>
    %c3_i32_48 = arith.constant 3 : i32
    %c0_i32_49 = arith.constant 0 : i32
    %81 = tpu.memref_slice %arg2[%80, %c0_i32_49] : memref<128x128xf32, #tpu.memory_space<any>> -> memref<1x128xf32, #tpu.memory_space<any>>
    %c3_i32_50 = arith.constant 3 : i32
    %c0_i32_51 = arith.constant 0 : i32
    %82 = tpu.memref_slice %arg4[%c3_i32_50, %c0_i32_51] : memref<8x128xf32, #tpu.memory_space<vmem>> -> memref<1x128xf32, #tpu.memory_space<vmem>>
    %83 = tpu.memref_slice %arg5[%c3_i32_48] : memref<8x!tpu.dma_semaphore, #tpu.memory_space<semaphore_mem>> -> memref<1x!tpu.dma_semaphore, #tpu.memory_space<semaphore_mem>>
    %84 = tpu.memref_squeeze %83 : memref<1x!tpu.dma_semaphore, #tpu.memory_space<semaphore_mem>> -> memref<!tpu.dma_semaphore, #tpu.memory_space<semaphore_mem>>
    tpu.wait_dma2 semaphore(%84 : memref<!tpu.dma_semaphore, #tpu.memory_space<semaphore_mem>>) src(%81 : memref<1x128xf32, #tpu.memory_space<any>>) dst(%82 : memref<1x128xf32, #tpu.memory_space<vmem>>)
    %c4_i32_52 = arith.constant 4 : i32
    %85 = arith.addi %0, %c4_i32_52 : i32
    %86 = arith.index_cast %85 : i32 to index
    %87 = memref.load %arg1[%86] : memref<16xi32, #tpu.memory_space<smem>>
    %c4_i32_53 = arith.constant 4 : i32
    %c0_i32_54 = arith.constant 0 : i32
    %88 = tpu.memref_slice %arg2[%87, %c0_i32_54] : memref<128x128xf32, #tpu.memory_space<any>> -> memref<1x128xf32, #tpu.memory_space<any>>
    %c4_i32_55 = arith.constant 4 : i32
    %c0_i32_56 = arith.constant 0 : i32
    %89 = tpu.memref_slice %arg4[%c4_i32_55, %c0_i32_56] : memref<8x128xf32, #tpu.memory_space<vmem>> -> memref<1x128xf32, #tpu.memory_space<vmem>>
    %90 = tpu.memref_slice %arg5[%c4_i32_53] : memref<8x!tpu.dma_semaphore, #tpu.memory_space<semaphore_mem>> -> memref<1x!tpu.dma_semaphore, #tpu.memory_space<semaphore_mem>>
    %91 = tpu.memref_squeeze %90 : memref<1x!tpu.dma_semaphore, #tpu.memory_space<semaphore_mem>> -> memref<!tpu.dma_semaphore, #tpu.memory_space<semaphore_mem>>
    tpu.wait_dma2 semaphore(%91 : memref<!tpu.dma_semaphore, #tpu.memory_space<semaphore_mem>>) src(%88 : memref<1x128xf32, #tpu.memory_space<any>>) dst(%89 : memref<1x128xf32, #tpu.memory_space<vmem>>)
    %c5_i32_57 = arith.constant 5 : i32
    %92 = arith.addi %0, %c5_i32_57 : i32
    %93 = arith.index_cast %92 : i32 to index
    %94 = memref.load %arg1[%93] : memref<16xi32, #tpu.memory_space<smem>>
    %c5_i32_58 = arith.constant 5 : i32
    %c0_i32_59 = arith.constant 0 : i32
    %95 = tpu.memref_slice %arg2[%94, %c0_i32_59] : memref<128x128xf32, #tpu.memory_space<any>> -> memref<1x128xf32, #tpu.memory_space<any>>
    %c5_i32_60 = arith.constant 5 : i32
    %c0_i32_61 = arith.constant 0 : i32
    %96 = tpu.memref_slice %arg4[%c5_i32_60, %c0_i32_61] : memref<8x128xf32, #tpu.memory_space<vmem>> -> memref<1x128xf32, #tpu.memory_space<vmem>>
    %97 = tpu.memref_slice %arg5[%c5_i32_58] : memref<8x!tpu.dma_semaphore, #tpu.memory_space<semaphore_mem>> -> memref<1x!tpu.dma_semaphore, #tpu.memory_space<semaphore_mem>>
    %98 = tpu.memref_squeeze %97 : memref<1x!tpu.dma_semaphore, #tpu.memory_space<semaphore_mem>> -> memref<!tpu.dma_semaphore, #tpu.memory_space<semaphore_mem>>
    tpu.wait_dma2 semaphore(%98 : memref<!tpu.dma_semaphore, #tpu.memory_space<semaphore_mem>>) src(%95 : memref<1x128xf32, #tpu.memory_space<any>>) dst(%96 : memref<1x128xf32, #tpu.memory_space<vmem>>)
    %c6_i32_62 = arith.constant 6 : i32
    %99 = arith.addi %0, %c6_i32_62 : i32
    %100 = arith.index_cast %99 : i32 to index
    %101 = memref.load %arg1[%100] : memref<16xi32, #tpu.memory_space<smem>>
    %c6_i32_63 = arith.constant 6 : i32
    %c0_i32_64 = arith.constant 0 : i32
    %102 = tpu.memref_slice %arg2[%101, %c0_i32_64] : memref<128x128xf32, #tpu.memory_space<any>> -> memref<1x128xf32, #tpu.memory_space<any>>
    %c6_i32_65 = arith.constant 6 : i32
    %c0_i32_66 = arith.constant 0 : i32
    %103 = tpu.memref_slice %arg4[%c6_i32_65, %c0_i32_66] : memref<8x128xf32, #tpu.memory_space<vmem>> -> memref<1x128xf32, #tpu.memory_space<vmem>>
    %104 = tpu.memref_slice %arg5[%c6_i32_63] : memref<8x!tpu.dma_semaphore, #tpu.memory_space<semaphore_mem>> -> memref<1x!tpu.dma_semaphore, #tpu.memory_space<semaphore_mem>>
    %105 = tpu.memref_squeeze %104 : memref<1x!tpu.dma_semaphore, #tpu.memory_space<semaphore_mem>> -> memref<!tpu.dma_semaphore, #tpu.memory_space<semaphore_mem>>
    tpu.wait_dma2 semaphore(%105 : memref<!tpu.dma_semaphore, #tpu.memory_space<semaphore_mem>>) src(%102 : memref<1x128xf32, #tpu.memory_space<any>>) dst(%103 : memref<1x128xf32, #tpu.memory_space<vmem>>)
    %c7_i32_67 = arith.constant 7 : i32
    %106 = arith.addi %0, %c7_i32_67 : i32
    %107 = arith.index_cast %106 : i32 to index
    %108 = memref.load %arg1[%107] : memref<16xi32, #tpu.memory_space<smem>>
    %c7_i32_68 = arith.constant 7 : i32
    %c0_i32_69 = arith.constant 0 : i32
    %109 = tpu.memref_slice %arg2[%108, %c0_i32_69] : memref<128x128xf32, #tpu.memory_space<any>> -> memref<1x128xf32, #tpu.memory_space<any>>
    %c7_i32_70 = arith.constant 7 : i32
    %c0_i32_71 = arith.constant 0 : i32
    %110 = tpu.memref_slice %arg4[%c7_i32_70, %c0_i32_71] : memref<8x128xf32, #tpu.memory_space<vmem>> -> memref<1x128xf32, #tpu.memory_space<vmem>>
    %111 = tpu.memref_slice %arg5[%c7_i32_68] : memref<8x!tpu.dma_semaphore, #tpu.memory_space<semaphore_mem>> -> memref<1x!tpu.dma_semaphore, #tpu.memory_space<semaphore_mem>>
    %112 = tpu.memref_squeeze %111 : memref<1x!tpu.dma_semaphore, #tpu.memory_space<semaphore_mem>> -> memref<!tpu.dma_semaphore, #tpu.memory_space<semaphore_mem>>
    tpu.wait_dma2 semaphore(%112 : memref<!tpu.dma_semaphore, #tpu.memory_space<semaphore_mem>>) src(%109 : memref<1x128xf32, #tpu.memory_space<any>>) dst(%110 : memref<1x128xf32, #tpu.memory_space<vmem>>)
    %c0 = arith.constant 0 : index
    %c0_72 = arith.constant 0 : index
    %113 = vector.load %arg4[%c0, %c0_72] : memref<8x128xf32, #tpu.memory_space<vmem>>, vector<8x128xf32>
    %c0_73 = arith.constant 0 : index
    %c0_74 = arith.constant 0 : index
    %114 = vector.load %arg3[%c0_73, %c0_74] : memref<8x128xf32, #tpu.memory_space<vmem>>, vector<8x128xf32>
    tpu.vector_store %arg3[%c0_73, %c0_74], %113 {strides = array<i32>} : memref<8x128xf32, #tpu.memory_space<vmem>>, vector<8x128xf32>,
    return
  }
  func.func @transform_1(%arg0: i32, %arg1: memref<16xi32, #tpu.memory_space<smem>>) -> (i32, i32) {
    %c0_i32 = arith.constant 0 : i32
    %c0_i32_0 = arith.constant 0 : i32
    return %arg0, %c0_i32 : i32, i32
  }
}

</mosaic_0001>

<bundles_post_ra>
// kernel: tpu_custom_call.1
= control target key start
LH: loop header
LB: loop body
LE: loop exit
PB: predicated region body
PF: predicated region fallthrough
CT: control target
= control target key end

     0   :  { %s934_s0 = inlined_call_operand.hbm [shape: s32[16], index: 0, kind: input, shape index: {}]   ;;  %s935_s1 = inlined_call_operand.hbm [shape: f32[128,128], index: 1, kind: input, shape index: {}]   ;;  %s936_s2 = inlined_call_operand.hbm [shape: f32[16,128], index: 2, kind: output, shape index: {}]  }
   0x1   :  { %s406_s11 = scalar_lea.hbm %s934_s0, 16 }
   0x2   :  { %p407_p0 = scmp.ne.s32.totalorder %s934_s0, %s406_s11  ;;  %p410_p1 = scmp.lt.u32.totalorder %s406_s11, %s934_s0 }
   0x4   :  { %p412_p2 = pnand %p410_p1, %p407_p0 }
   0x6   :  { %415 = shalt.err (!%p412_p2)  }
   0x7   :  { %s682_s16 = smov [#allocation5]  }
   0x8   :  { %8 = dma.hbm_to_smem %s934_s0, 16, %s682_s16, [#allocation4] }
   0x9   :  { %648 = dma.done.wait [#allocation4], 16 }
   0xa   :  { %649 = vsyncadd [#allocation4], 4294967280 }
   0xb   :  { %10 = sfence }
   0xc   :  { %11 = vsyncpa [#allocation7], 0 }
   0xd   :  { %13 = vsyncpa [#allocation7 + $0x1], 0  ;;  %s719_s19 = smov 0   ;;  %s721_s20 = smov 0  }
   0xe   :  { %s723_s21 = smov 0  }
   0xf LB: > { %s341_s0 = sadd.s32 4294967295, %s680_s21   ;;  %s736_s22 = sadd.s32 1, %s680_s21   ;;  %s680_s21 = sphi %s723_s21, %s941_s21   ;;  %s676_s20 = sphi %s721_s20, %s940_s20   ;;  %s672_s19 = sphi %s719_s19, %s939_s19  }
  0x10   : > { %s22_s23 = ssub.s32 %s680_s21, %s736_s22  ;;  %s25_s24 = sadd.s32 1, %s676_s20 }
  0x11   : > { %p23_p3 = scmp.eq.s32.totalorder %s22_s23, 0  ;;  %p342_p4 = scmp.ne.s32.totalorder %s22_s23, 0 }
  0x12   : > { %p29_p5 = scmp.eq.s32.totalorder %s680_s21, 1  ;;  %p34_p6 = scmp.ne.s32.totalorder %s676_s20, %s672_s19 }
  0x13   : > { %s745_s25 = scalar_select %p23_p3, %s676_s20, %s25_s24  }
  0x14   : > { %p747_p7 = por %p342_p4, %p29_p5  ;;  %p35_p8 = scmp.eq.s32.totalorder %s341_s0, 1 }
  0x15   : > { %p343_p10 = scmp.ge.s32.totalorder %s680_s21, 2 }
  0x16   : > { %p751_p9 = por %p35_p8, %p34_p6  ;;  %s49_s28 = sand.u32 (!%p343_p10), 1, %s676_s20  }
  0x17   : > { %44 = sbr.rel (%p343_p10) target bundleno = 244 (0xf4), region = 12  ;;  %s758_s29 = sshll.u32 (!%p343_p10), %s680_s21, 3 }
  0x18   : > { %s762_s30 = sshll.u32 (!%p343_p10), %s49_s28, 3  ;;  %s53_s3 = sld [smem:[#allocation5 + %s758_s29]] (!%p343_p10) }
  0x19   : > { %s683_s4 = smov (!%p343_p10), [#allocation2]   ;;  %s67_s6 = sadd.s32 (!%p343_p10), 1, %s758_s29 }
  0x1a   : > { %s63_s5 = sshll.u32 (!%p343_p10), %s683_s4, 4  ;;  %s768_s7 = sld [smem:[#allocation5 + %s67_s6]] (!%p343_p10)  ;;  %s766_s5 = int_to_ptr.vmem [resolvable:$true] %s63_s5 }
  0x1b   : > { %s84_s8 = sadd.s32 (!%p343_p10), 2, %s758_s29  ;;  %s684_s9 = smov (!%p343_p10), [#allocation2 + $0x1]  }
  0x1c   : > { %s80_s10 = sshll.u32 (!%p343_p10), %s684_s9, 4  ;;  %s771_s11 = sld [smem:[#allocation5 + %s84_s8]] (!%p343_p10)  ;;  %s773_s10 = int_to_ptr.vmem [resolvable:$true] %s80_s10 }
  0x1d   : > { %s781_s0 = scalar_lea.hbm (!%p343_p10), %s935_s1, 2048 }
  0x1e   : > { %s346_s12 = sshll.u32 %s53_s3, 4 }
  0x1f   : > { %s55_s15 = scalar_lea.hbm %s935_s1, %s346_s12 }
  0x20   : > { %s416_s16 = scalar_lea.hbm %s55_s15, 16  ;;  %p419_p12 = scmp.lt.u32.totalorder %s55_s15, %s935_s1 }
  0x21   : > { %p417_p11 = scmp.ne.s32.totalorder %s55_s15, %s416_s16  ;;  %p420_p13 = scmp.lt.u32.totalorder %s781_s0, %s416_s16 }
  0x22   : > { %p422_p1 = scmp.lt.u32.totalorder %s416_s16, %s55_s15 }
  0x23   : > { %p421_p0 = por %p420_p13, %p419_p12 }
  0x25   : > { %p423_p2 = por %p422_p1, %p421_p0 }
  0x27   : > { %p424_p3 = pnand %p423_p2, %p417_p11 }
  0x29   : > { %427 = shalt.err (!%p424_p3)  }
  0x2a   : > { %s428_s3 = scalar_lea.vmem %s766_s5, 16  ;;  %s790_s4 = scalar_lea.vmem %s766_s5, 128 }
  0x2b   : > { %p429_p4 = scmp.ne.s32.totalorder %s766_s5, %s428_s3  ;;  %p433_p5 = scmp.lt.s32.totalorder %s766_s5, %s766_s5 }
  0x2c   : > { %p434_p6 = scmp.lt.s32.totalorder %s790_s4, %s428_s3 }
  0x2e   : > { %p435_p8 = por %p434_p6, %p433_p5 }
  0x30   : > { %p436_p10 = pnand %p435_p8, %p429_p4 }
  0x32   : > { %439 = shalt.err (!%p436_p10)  }
  0x33   : > { %66 = dma.hbm_to_vmem [thread:$0]  %s55_s15, 16, %s766_s5, [#allocation3] }
  0x34   : > { %s347_s6 = sshll.u32 %s768_s7, 4  ;;  %s685_s8 = smov [#allocation2 + $0x2]  }
  0x35   : > { %s97_s9 = sshll.u32 %s685_s8, 4  ;;  %s70_s14 = scalar_lea.hbm %s935_s1, %s347_s6  ;;  %s800_s9 = int_to_ptr.vmem [resolvable:$true] %s97_s9 }
  0x36   : > { %s440_s16 = scalar_lea.hbm %s70_s14, 16  ;;  %p443_p12 = scmp.lt.u32.totalorder %s70_s14, %s935_s1 }
  0x37   : > { %p441_p11 = scmp.ne.s32.totalorder %s70_s14, %s440_s16  ;;  %p444_p13 = scmp.lt.u32.totalorder %s781_s0, %s440_s16 }
  0x38   : > { %p446_p1 = scmp.lt.u32.totalorder %s440_s16, %s70_s14 }
  0x39   : > { %p445_p0 = por %p444_p13, %p443_p12 }
  0x3b   : > { %p447_p2 = por %p446_p1, %p445_p0 }
  0x3d   : > { %p448_p3 = pnand %p447_p2, %p441_p11 }
  0x3f   : > { %451 = shalt.err (!%p448_p3)  }
  0x40   : > { %s452_s7 = scalar_lea.vmem %s773_s10, 16  ;;  %p457_p5 = scmp.lt.s32.totalorder %s773_s10, %s766_s5 }
  0x41   : > { %p453_p4 = scmp.ne.s32.totalorder %s773_s10, %s452_s7  ;;  %p458_p6 = scmp.lt.s32.totalorder %s790_s4, %s452_s7 }
  0x43   : > { %p459_p8 = por %p458_p6, %p457_p5 }
  0x45   : > { %p460_p10 = pnand %p459_p8, %p453_p4 }
  0x47   : > { %463 = shalt.err (!%p460_p10)  }
  0x48   : > { %83 = dma.hbm_to_vmem [thread:$0]  %s70_s14, 16, %s773_s10, [#allocation3 + $0x1] }
  0x49   : > { %s348_s15 = sshll.u32 %s771_s11, 4  ;;  %s101_s23 = sadd.s32 3, %s758_s29 }
  0x4a   : > { %s87_s6 = scalar_lea.hbm %s935_s1, %s348_s15  ;;  %s817_s8 = sld [smem:[#allocation5 + %s101_s23]] }
  0x4b   : > { %s464_s12 = scalar_lea.hbm %s87_s6, 16  ;;  %p467_p12 = scmp.lt.u32.totalorder %s87_s6, %s935_s1 }
  0x4c   : > { %p465_p11 = scmp.ne.s32.totalorder %s87_s6, %s464_s12  ;;  %p468_p13 = scmp.lt.u32.totalorder %s781_s0, %s464_s12 }
  0x4d   : > { %p470_p1 = scmp.lt.u32.totalorder %s464_s12, %s87_s6 }
  0x4e   : > { %p469_p0 = por %p468_p13, %p467_p12 }
  0x50   : > { %p471_p2 = por %p470_p1, %p469_p0 }
  0x52   : > { %p472_p3 = pnand %p471_p2, %p465_p11 }
  0x54   : > { %475 = shalt.err (!%p472_p3)  }
  0x55   : > { %s476_s10 = scalar_lea.vmem %s800_s9, 16  ;;  %p481_p5 = scmp.lt.s32.totalorder %s800_s9, %s766_s5 }
  0x56   : > { %p477_p4 = scmp.ne.s32.totalorder %s800_s9, %s476_s10  ;;  %p482_p6 = scmp.lt.s32.totalorder %s790_s4, %s476_s10 }
  0x58   : > { %p483_p8 = por %p482_p6, %p481_p5 }
  0x5a   : > { %p484_p10 = pnand %p483_p8, %p477_p4 }
  0x5c   : > { %487 = shalt.err (!%p484_p10)  }
  0x5d   : > { %100 = dma.hbm_to_vmem [thread:$0]  %s87_s6, 16, %s800_s9, [#allocation3 + $0x2] }
  0x5e   : > { %s118_s11 = sadd.s32 4, %s758_s29  ;;  %s686_s14 = smov [#allocation2 + $0x3]  }
  0x5f   : > { %s114_s17 = sshll.u32 %s686_s14, 4  ;;  %s119_s18 = sld [smem:[#allocation5 + %s118_s11]]  ;;  %s115_s17 = int_to_ptr.vmem [resolvable:$true] %s114_s17 }
  0x60   : > { %s687_s7 = smov [#allocation2 + $0x4]   ;;  %s135_s23 = sadd.s32 5, %s758_s29 }
  0x61   : > { %s131_s15 = sshll.u32 %s687_s7, 4  ;;  %s349_s24 = sshll.u32 %s817_s8, 4  ;;  %s832_s15 = int_to_ptr.vmem [resolvable:$true] %s131_s15 }
  0x62   : > { %s104_s13 = scalar_lea.hbm %s935_s1, %s349_s24  ;;  %s837_s16 = sld [smem:[#allocation5 + %s135_s23]] }
  0x63   : > { %s488_s10 = scalar_lea.hbm %s104_s13, 16  ;;  %p491_p12 = scmp.lt.u32.totalorder %s104_s13, %s935_s1 }
  0x64   : > { %p489_p11 = scmp.ne.s32.totalorder %s104_s13, %s488_s10  ;;  %p492_p13 = scmp.lt.u32.totalorder %s781_s0, %s488_s10 }
  0x65   : > { %p494_p1 = scmp.lt.u32.totalorder %s488_s10, %s104_s13 }
  0x66   : > { %p493_p0 = por %p492_p13, %p491_p12 }
  0x68   : > { %p495_p2 = por %p494_p1, %p493_p0 }
  0x6a   : > { %p496_p3 = pnand %p495_p2, %p489_p11 }
  0x6c   : > { %499 = shalt.err (!%p496_p3)  }
  0x6d   : > { %s500_s8 = scalar_lea.vmem %s115_s17, 16  ;;  %p505_p5 = scmp.lt.s32.totalorder %s115_s17, %s766_s5 }
  0x6e   : > { %p501_p4 = scmp.ne.s32.totalorder %s115_s17, %s500_s8  ;;  %p506_p6 = scmp.lt.s32.totalorder %s790_s4, %s500_s8 }
  0x70   : > { %p507_p8 = por %p506_p6, %p505_p5 }
  0x72   : > { %p508_p10 = pnand %p507_p8, %p501_p4 }
  0x74   : > { %511 = shalt.err (!%p508_p10)  }
  0x75   : > { %117 = dma.hbm_to_vmem [thread:$0]  %s104_s13, 16, %s115_s17, [#allocation3 + $0x3] }
  0x76   : > { %s350_s11 = sshll.u32 %s119_s18, 4  ;;  %s688_s24 = smov [#allocation2 + $0x5]  }
  0x77   : > { %s121_s23 = scalar_lea.hbm %s935_s1, %s350_s11  ;;  %s148_s3 = sshll.u32 %s688_s24, 4  ;;  %s149_s3 = int_to_ptr.vmem [resolvable:$true] %s148_s3 }
  0x78   : > { %s512_s12 = scalar_lea.hbm %s121_s23, 16  ;;  %p515_p12 = scmp.lt.u32.totalorder %s121_s23, %s935_s1 }
  0x79   : > { %p513_p11 = scmp.ne.s32.totalorder %s121_s23, %s512_s12  ;;  %p516_p13 = scmp.lt.u32.totalorder %s781_s0, %s512_s12 }
  0x7a   : > { %p518_p1 = scmp.lt.u32.totalorder %s512_s12, %s121_s23 }
  0x7b   : > { %p517_p0 = por %p516_p13, %p515_p12 }
  0x7d   : > { %p519_p2 = por %p518_p1, %p517_p0 }
  0x7f   : > { %p520_p3 = pnand %p519_p2, %p513_p11 }
  0x81   : > { %523 = shalt.err (!%p520_p3)  }
  0x82   : > { %s524_s17 = scalar_lea.vmem %s832_s15, 16  ;;  %p529_p5 = scmp.lt.s32.totalorder %s832_s15, %s766_s5 }
  0x83   : > { %p525_p4 = scmp.ne.s32.totalorder %s832_s15, %s524_s17  ;;  %p530_p6 = scmp.lt.s32.totalorder %s790_s4, %s524_s17 }
  0x85   : > { %p531_p8 = por %p530_p6, %p529_p5 }
  0x87   : > { %p532_p10 = pnand %p531_p8, %p525_p4 }
  0x89   : > { %535 = shalt.err (!%p532_p10)  }
  0x8a   : > { %134 = dma.hbm_to_vmem [thread:$0]  %s121_s23, 16, %s832_s15, [#allocation3 + $0x4] }
  0x8b   : > { %s152_s18 = sadd.s32 6, %s758_s29  ;;  %s351_s13 = sshll.u32 %s837_s16, 4 }
  0x8c   : > { %s153_s6 = sld [smem:[#allocation5 + %s152_s18]]  ;;  %s138_s14 = scalar_lea.hbm %s935_s1, %s351_s13 }
  0x8d   : > { %s536_s7 = scalar_lea.hbm %s138_s14, 16  ;;  %p539_p12 = scmp.lt.u32.totalorder %s138_s14, %s935_s1 }
  0x8e   : > { %p537_p11 = scmp.ne.s32.totalorder %s138_s14, %s536_s7  ;;  %p540_p13 = scmp.lt.u32.totalorder %s781_s0, %s536_s7 }
  0x8f   : > { %p542_p1 = scmp.lt.u32.totalorder %s536_s7, %s138_s14 }
  0x90   : > { %p541_p0 = por %p540_p13, %p539_p12 }
  0x92   : > { %p543_p2 = por %p542_p1, %p541_p0 }
  0x94   : > { %p544_p3 = pnand %p543_p2, %p537_p11 }
  0x96   : > { %547 = shalt.err (!%p544_p3)  }
  0x97   : > { %s548_s15 = scalar_lea.vmem %s149_s3, 16  ;;  %p553_p5 = scmp.lt.s32.totalorder %s149_s3, %s766_s5 }
  0x98   : > { %p549_p4 = scmp.ne.s32.totalorder %s149_s3, %s548_s15  ;;  %p554_p6 = scmp.lt.s32.totalorder %s790_s4, %s548_s15 }
  0x9a   : > { %p555_p8 = por %p554_p6, %p553_p5 }
  0x9c   : > { %p556_p10 = pnand %p555_p8, %p549_p4 }
  0x9e   : > { %559 = shalt.err (!%p556_p10)  }
  0x9f   : > { %151 = dma.hbm_to_vmem [thread:$0]  %s138_s14, 16, %s149_s3, [#allocation3 + $0x5] }
  0xa0   : > { %s689_s16 = smov [#allocation2 + $0x6]   ;;  %s169_s10 = sadd.s32 7, %s758_s29 }
  0xa1   : > { %s165_s23 = sshll.u32 %s689_s16, 4  ;;  %s170_s9 = sld [smem:[#allocation5 + %s169_s10]]  ;;  %s166_s23 = int_to_ptr.vmem [resolvable:$true] %s165_s23 }
  0xa2   : > { %s352_s17 = sshll.u32 %s153_s6, 4  ;;  %s690_s18 = smov [#allocation2 + $0x7]  }
  0xa3   : > { %s182_s13 = sshll.u32 %s690_s18, 4  ;;  %s155_s7 = scalar_lea.hbm %s935_s1, %s352_s17  ;;  %s183_s13 = int_to_ptr.vmem [resolvable:$true] %s182_s13 }
  0xa4   : > { %s560_s24 = scalar_lea.hbm %s155_s7, 16  ;;  %p563_p12 = scmp.lt.u32.totalorder %s155_s7, %s935_s1 }
  0xa5   : > { %p561_p11 = scmp.ne.s32.totalorder %s155_s7, %s560_s24  ;;  %p564_p13 = scmp.lt.u32.totalorder %s781_s0, %s560_s24 }
  0xa6   : > { %p566_p1 = scmp.lt.u32.totalorder %s560_s24, %s155_s7 }
  0xa7   : > { %p565_p0 = por %p564_p13, %p563_p12 }
  0xa9   : > { %p567_p2 = por %p566_p1, %p565_p0 }
  0xab   : > { %p568_p3 = pnand %p567_p2, %p561_p11 }
  0xad   : > { %571 = shalt.err (!%p568_p3)  }
  0xae   : > { %s572_s29 = scalar_lea.vmem %s166_s23, 16  ;;  %p577_p5 = scmp.lt.s32.totalorder %s166_s23, %s766_s5 }
  0xaf   : > { %p573_p4 = scmp.ne.s32.totalorder %s166_s23, %s572_s29  ;;  %p578_p6 = scmp.lt.s32.totalorder %s790_s4, %s572_s29 }
  0xb1   : > { %p579_p8 = por %p578_p6, %p577_p5 }
  0xb3   : > { %p580_p10 = pnand %p579_p8, %p573_p4 }
  0xb5   : > { %583 = shalt.err (!%p580_p10)  }
  0xb6   : > { %168 = dma.hbm_to_vmem [thread:$0]  %s155_s7, 16, %s166_s23, [#allocation3 + $0x6] }
  0xb7   : > { %s353_s3 = sshll.u32 %s170_s9, 4 }
  0xb8   : > { %s172_s16 = scalar_lea.hbm %s935_s1, %s353_s3 }
  0xb9   : > { %s584_s10 = scalar_lea.hbm %s172_s16, 16  ;;  %p587_p12 = scmp.lt.u32.totalorder %s172_s16, %s935_s1 }
  0xba   : > { %p585_p11 = scmp.ne.s32.totalorder %s172_s16, %s584_s10  ;;  %p588_p13 = scmp.lt.u32.totalorder %s781_s0, %s584_s10 }
  0xbb   : > { %p590_p1 = scmp.lt.u32.totalorder %s584_s10, %s172_s16 }
  0xbc   : > { %p589_p0 = por %p588_p13, %p587_p12 }
  0xbe   : > { %p591_p2 = por %p590_p1, %p589_p0 }
  0xc0   : > { %p592_p3 = pnand %p591_p2, %p585_p11 }
  0xc2   : > { %595 = shalt.err (!%p592_p3)  }
  0xc3   : > { %s596_s23 = scalar_lea.vmem %s183_s13, 16  ;;  %p601_p5 = scmp.lt.s32.totalorder %s183_s13, %s766_s5 }
  0xc4   : > { %p597_p4 = scmp.ne.s32.totalorder %s183_s13, %s596_s23  ;;  %p602_p6 = scmp.lt.s32.totalorder %s790_s4, %s596_s23 }
  0xc6   : > { %p603_p8 = por %p602_p6, %p601_p5 }
  0xc8   : > { %p604_p10 = pnand %p603_p8, %p597_p4 }
  0xca   : > { %607 = shalt.err (!%p604_p10)  }
  0xcb   : > { %185 = dma.hbm_to_vmem [thread:$0]  %s172_s16, 16, %s183_s13, [#allocation3 + $0x7] }
  0xcc   : > { %s51_s9 = scalar_lea.vmem [#allocation6], %s762_s30 }
  0xcd   : > { %650 = dma.done.wait [#allocation3], 16 }
  0xce   : > { %651 = vsyncadd [#allocation3], 4294967280 }
  0xcf   : > { %652 = dma.done.wait [#allocation3 + $0x1], 16 }
  0xd0   : > { %653 = vsyncadd [#allocation3 + $0x1], 4294967280 }
  0xd1   : > { %654 = dma.done.wait [#allocation3 + $0x2], 16 }
  0xd2   : > { %655 = vsyncadd [#allocation3 + $0x2], 4294967280 }
  0xd3   : > { %656 = dma.done.wait [#allocation3 + $0x3], 16 }
  0xd4   : > { %657 = vsyncadd [#allocation3 + $0x3], 4294967280 }
  0xd5   : > { %658 = dma.done.wait [#allocation3 + $0x4], 16 }
  0xd6   : > { %659 = vsyncadd [#allocation3 + $0x4], 4294967280 }
  0xd7   : > { %660 = dma.done.wait [#allocation3 + $0x5], 16 }
  0xd8   : > { %661 = vsyncadd [#allocation3 + $0x5], 4294967280 }
  0xd9   : > { %662 = dma.done.wait [#allocation3 + $0x6], 16 }
  0xda   : > { %663 = vsyncadd [#allocation3 + $0x6], 4294967280 }
  0xdb   : > { %664 = dma.done.wait [#allocation3 + $0x7], 16 }
  0xdc   : > { %665 = vsyncadd [#allocation3 + $0x7], 4294967280  ;;  %s355_s30 = sshll.u32 %s680_s21, 7  ;;  %s227_s5 = sshll.u32 %s51_s9, 4  ;;  %v211_v0 = vld [vmem:[#allocation2] sm:$0xff]  ;;  %s895_s5 = int_to_ptr.vmem [resolvable:$true] %s227_s5 }
  0xdd   : > { %s893_s13 = scalar_lea.hbm %s936_s2, %s355_s30  ;;  %212 = vst [vmem:[%s51_s9] sm:$0xff] %v211_v0  ;;  %s214_s8 = scalar_lea.sflag [#allocation7], %s49_s28 }
  0xde   : > { %s608_s11 = scalar_lea.vmem %s895_s5, 128  ;;  %s691_s7 = smov [#allocation6]  }
  0xdf   : > { %p609_p11 = scmp.ne.s32.totalorder %s895_s5, %s608_s11  ;;  %s612_s24 = sshll.u32 %s691_s7, 4  ;;  %s613_s24 = int_to_ptr.vmem [resolvable:$false] %s612_s24 }
  0xe0   : > { %s614_s12 = scalar_lea.vmem %s613_s24, 256  ;;  %p615_p0 = scmp.lt.s32.totalorder %s895_s5, %s613_s24 }
  0xe1   : > { %p610_p12 = pnand %p609_p11, %p747_p7  ;;  %p616_p1 = scmp.lt.s32.totalorder %s614_s12, %s608_s11 }
  0xe3   : > { %p611_p13 = pneg %p610_p12  ;;  %p617_p2 = por %p616_p1, %p615_p0 }
  0xe5   : > { %p618_p3 = pnand %p617_p2, %p611_p13 }
  0xe7   : > { %621 = shalt.err (!%p618_p3)
}
  0xe8   : > { %s622_s28 = scalar_lea.hbm %s893_s13, 128  ;;  %s626_s3 = scalar_lea.hbm %s936_s2, 256 }
  0xe9   : > { %p623_p4 = scmp.ne.s32.totalorder %s893_s13, %s622_s28  ;;  %p627_p8 = scmp.lt.u32.totalorder %s893_s13, %s936_s2 }
  0xea   : > { %p628_p10 = scmp.lt.u32.totalorder %s626_s3, %s622_s28  ;;  %p630_p12 = scmp.lt.u32.totalorder %s622_s28, %s893_s13 }
  0xeb   : > { %p624_p5 = pnand %p623_p4, %p747_p7 }
  0xec   : > { %p629_p11 = por %p628_p10, %p627_p8 }
  0xed   : > { %p625_p6 = pneg %p624_p5 }
  0xee   : > { %p631_p13 = por %p630_p12, %p629_p11 }
  0xf0   : > { %p632_p0 = pnand %p631_p13, %p625_p6 }
  0xf2   : > { %635 = shalt.err (!%p632_p0)
}
  0xf3   : > { %366 = dma.vmem_to_hbm [thread:$0]  (%p747_p7), %s895_s5, 128, %s893_s13, %s214_s8  }
  0xf4 PF: > { %p372_p1 = scmp.ge.s32.totalorder %s680_s21, 1  ;;  %s239_s16 = sand.u32 1, %s672_s19  }
  0xf5   : > { %s240_s10 = scalar_lea.sflag [#allocation7], %s239_s16 }
  0xf6   : > { %p369_p2 = pnand %p372_p1, %p751_p9 }
  0xf8   : > { %667 = dma.done.wait (!%p369_p2), %s240_s10, 128  }
  0xf9   : > { %669 = vsyncadd (!%p369_p2), %s240_s10, 4294967168  ;;  %p16_p3 = scmp.ge.s32.totalorder %s736_s22, 3   ;;  %s939_s19 = smov %s676_s20 }
  0xfa   : > { %s940_s20 = smov %s745_s25  ;;  %s941_s21 = smov %s736_s22 }
  0xfb   :  { %18 = sbr.rel (!%p16_p3) target bundleno = 15 (0xf), region = 105 }
 0x102   :  { %245 = vsyncpa [#allocation7], 1 }
 0x103   :  { %247 = vsyncpa [#allocation7 + $0x1], 1 }
 0x104   :  { %248 = vsyncmov [#allocation3] }
 0x107   :  { %s249_s21 = vpop.sfrf %248 }
 0x108   :  { %p358_p7 = scmp.ne.s32.totalorder %s249_s21, 0 }
 0x10a   :  { %253 = shalt.err (%p358_p7)  }
 0x10b   :  { %255 = vsyncmov [#allocation3 + $0x1] }
 0x10e   :  { %s256_s26 = vpop.sfrf %255 }
 0x10f   :  { %p359_p9 = scmp.ne.s32.totalorder %s256_s26, 0 }
 0x111   :  { %260 = shalt.err (%p359_p9)  }
 0x112   :  { %262 = vsyncmov [#allocation3 + $0x2] }
 0x115   :  { %s263_s27 = vpop.sfrf %262 }
 0x116   :  { %p360_p4 = scmp.ne.s32.totalorder %s263_s27, 0 }
 0x118   :  { %267 = shalt.err (%p360_p4)  }
 0x119   :  { %269 = vsyncmov [#allocation3 + $0x3] }
 0x11c   :  { %s270_s17 = vpop.sfrf %269 }
 0x11d   :  { %p361_p5 = scmp.ne.s32.totalorder %s270_s17, 0 }
 0x11f   :  { %274 = shalt.err (%p361_p5)  }
 0x120   :  { %276 = vsyncmov [#allocation3 + $0x4] }
 0x123   :  { %s277_s22 = vpop.sfrf %276 }
 0x124   :  { %p362_p6 = scmp.ne.s32.totalorder %s277_s22, 0 }
 0x126   :  { %281 = shalt.err (%p362_p6)  }
 0x127   :  { %283 = vsyncmov [#allocation3 + $0x5] }
 0x12a   :  { %s284_s1 = vpop.sfrf %283 }
 0x12b   :  { %p363_p8 = scmp.ne.s32.totalorder %s284_s1, 0 }
 0x12d   :  { %288 = shalt.err (%p363_p8)  }
 0x12e   :  { %290 = vsyncmov [#allocation3 + $0x6] }
 0x131   :  { %s291_s2 = vpop.sfrf %290 }
 0x132   :  { %p364_p10 = scmp.ne.s32.totalorder %s291_s2, 0 }
 0x134   :  { %295 = shalt.err (%p364_p10)  }
 0x135   :  { %297 = vsyncmov [#allocation3 + $0x7] }
 0x138   :  { %s298_s19 = vpop.sfrf %297 }
 0x139   :  { %p365_p11 = scmp.ne.s32.totalorder %s298_s19, 0 }
 0x13b   :  { %302 = shalt.err (%p365_p11)  }

</bundles_post_ra>
